<compile_context>
chip_gen: v6e
topology: v6e:2x2x1
jax: 0.10.0
libtpu: 0.0.40
codegen_flags: <defaults>
</compile_context>

<pallas_src>
import functools

import jax
import jax.numpy as jnp
from jax.experimental import pallas as pl
from jax.experimental.pallas import tpu as pltpu


MATMUL_DTYPE = jnp.bfloat16      # MXU input dtype (accumulation is always f32)
_BN_EPS = 1e-5                   # nn.BatchNorm2d default eps
_TM_TARGET = 512                 # lanes per M-tile (512 ~ HBM roofline sweet spot)
_LANES = 128
_VMEM_LIMIT = 32 * 1024 * 1024   # explicit scoped-VMEM budget; safe on v5e/v6e/v7x


def _round_up(x, m):
    return (x + m - 1) // m * m


# ---------------------------------------------------------------------------
# Pass 1: conv matmul per M-tile + streaming BatchNorm statistics.
#   y = W @ patches per tile; per-channel sum / sum-of-squares accumulated in
#   VMEM scratch; folded scale/shift finalized on the last tile.
#   The grid axis is a reduction for the stats -> "arbitrary".
# ---------------------------------------------------------------------------
def _conv_stats_kernel(p_ref, w_ref, g_ref, b_ref,           # inputs
                       y_ref, scale_ref, shift_ref,          # outputs
                       sum_ref, ssq_ref,                     # VMEM scratch
                       *, m_valid, tile_m, eps):
    i = pl.program_id(0)

    @pl.when(i == 0)
    def _init():
        sum_ref[...] = jnp.zeros_like(sum_ref)
        ssq_ref[...] = jnp.zeros_like(ssq_ref)

    # Conv as a lane-dense matmul: (C_out, K) @ (K, TM) -> (C_out, TM), f32 accumulate.
    # No conv bias: it is exactly cancelled by the training-mode BN mean subtraction.
    acc = jnp.dot(w_ref[...], p_ref[...], preferred_element_type=jnp.float32)
    y_ref[...] = acc

    if m_valid % tile_m != 0:
        # Defensive mask of the zero-padded lane tail (zeros contribute nothing anyway
        # since there is no bias, but keep the stats independent of padding convention).
        col = i * tile_m + jax.lax.broadcasted_iota(jnp.int32, acc.shape, 1)
        accv = acc * (col < m_valid).astype(jnp.float32)
    else:
        accv = acc
    sum_ref[...] += jnp.sum(accv, axis=1, keepdims=True)
    ssq_ref[...] += jnp.sum(accv * acc, axis=1, keepdims=True)

    @pl.when(i == pl.num_programs(0) - 1)
    def _finalize():
        inv_m = 1.0 / m_valid
        mean = sum_ref[...] * inv_m
        var = ssq_ref[...] * inv_m - mean * mean          # biased variance (training BN)
        s = g_ref[...] * jax.lax.rsqrt(var + eps)
        scale_ref[...] = s
        shift_ref[...] = b_ref[...] - mean * s


# ---------------------------------------------------------------------------
# Pass 2: y*scale + shift, ReLU.  Independent M tiles -> "parallel" (megacore on v7x).
# ---------------------------------------------------------------------------
def _bn_relu_kernel(y_ref, scale_ref, shift_ref, o_ref):
    y = y_ref[...] * scale_ref[...] + shift_ref[...]
    o_ref[...] = jnp.maximum(y, 0.0).astype(o_ref.dtype)


def _im2col_cf(x, kh, kw, stride, pad):
    """Channel-first im2col: (C, N, H, W) -> (C*kh*kw, N*Ho*Wo). Transpose-free."""
    C, N, H, W = x.shape
    ph, pw = pad
    xp = jnp.pad(x, ((0, 0), (0, 0), (ph, ph), (pw, pw)))
    Ho = (H + 2 * ph - kh) // stride + 1
    Wo = (W + 2 * pw - kw) // stride + 1
    taps = []
    for i in range(kh):
        for j in range(kw):
            taps.append(xp[:, :, i:i + stride * Ho:stride, j:j + stride * Wo:stride])
    p = jnp.stack(taps, axis=1)                       # (C, kh*kw, N, Ho, Wo)
    return p.reshape(C * kh * kw, N * Ho * Wo), Ho, Wo


def _conv_bn_relu_stage(x_cf, w, gamma, beta, ksize, stride, pad, out_dtype):
    """One Conv2d(no bias) + BatchNorm2d(train) + ReLU stage.

    x_cf: (C_in, N, H, W); w: (C_out, C_in, kh, kw).  Returns (C_out, N, Ho, Wo).
    """
    C_in, N, H, W = x_cf.shape
    kh, kw = ksize
    C_out = w.shape[0]

    patches, Ho, Wo = _im2col_cf(x_cf, kh, kw, stride, pad)
    K, M = patches.shape
    tile_m = min(_TM_TARGET, _round_up(M, _LANES))
    m_pad = _round_up(M, tile_m)
    if m_pad != M:
        patches = jnp.pad(patches, ((0, 0), (0, m_pad - M)))
    patches = patches.astype(MATMUL_DTYPE)
    wm = w.reshape(C_out, K).astype(MATMUL_DTYPE)
    g = gamma.reshape(C_out, 1).astype(jnp.float32)
    b = beta.reshape(C_out, 1).astype(jnp.float32)
    grid = (m_pad // tile_m,)

    chan_spec = pl.BlockSpec((C_out, 1), lambda i: (0, 0))

    # Pass 1: conv matmul + streaming stats (accumulators carry -> "arbitrary").
    y, scale, shift = pl.pallas_call(
        functools.partial(_conv_stats_kernel, m_valid=M, tile_m=tile_m, eps=_BN_EPS),
        out_shape=(jax.ShapeDtypeStruct((C_out, m_pad), jnp.float32),
                   jax.ShapeDtypeStruct((C_out, 1), jnp.float32),
                   jax.ShapeDtypeStruct((C_out, 1), jnp.float32)),
        grid=grid,
        in_specs=[pl.BlockSpec((K, tile_m), lambda i: (0, i)),
                  pl.BlockSpec((C_out, K), lambda i: (0, 0)),
                  chan_spec, chan_spec],
        out_specs=(pl.BlockSpec((C_out, tile_m), lambda i: (0, i)),
                   chan_spec, chan_spec),
        scratch_shapes=[pltpu.VMEM((C_out, 1), jnp.float32),
                        pltpu.VMEM((C_out, 1), jnp.float32)],
        compiler_params=pltpu.CompilerParams(
            dimension_semantics=("arbitrary",),
            vmem_limit_bytes=_VMEM_LIMIT),
    )(patches, wm, g, b)

    # Pass 2: normalize + ReLU with the precomputed global scale/shift.
    out = pl.pallas_call(
        _bn_relu_kernel,
        out_shape=jax.ShapeDtypeStruct((C_out, m_pad), out_dtype),
        grid=grid,
        in_specs=[pl.BlockSpec((C_out, tile_m), lambda i: (0, i)),
                  chan_spec, chan_spec],
        out_specs=pl.BlockSpec((C_out, tile_m), lambda i: (0, i)),
        compiler_params=pltpu.CompilerParams(
            dimension_semantics=("parallel",),
            vmem_limit_bytes=_VMEM_LIMIT),
    )(y, scale, shift)

    return out[:, :M].reshape(C_out, N, Ho, Wo)


@functools.partial(jax.jit, static_argnames=("kernel_size", "stride", "padding"))
def _block_forward(x, w1, g1, be1, w2, g2, be2, *, kernel_size, stride, padding):
    kh, kw = kernel_size
    ph, pw = padding
    xc = jnp.transpose(x, (1, 0, 2, 3))                       # NCHW -> (C, N, H, W), once
    h = _conv_bn_relu_stage(xc, w1, g1, be1, (kh, kw), stride, (ph, pw),
                            out_dtype=MATMUL_DTYPE)           # stay bf16 between stages
    y = _conv_bn_relu_stage(h, w2, g2, be2, (kw, kh), stride, (pw, ph),
                            out_dtype=jnp.float32)
    return jnp.transpose(y, (1, 0, 2, 3))                     # back to NCHW


class BasicConvBlockPallas:
    """Mirrors BasicConvBlock; forward runs the two fused Pallas conv+BN+ReLU stages."""

    def __init__(self, in_channels, out_channels, kernel_size, stride, padding, key):
        kh, kw = kernel_size
        k1, k2, k3, k4 = jax.random.split(key, 4)
        self.w1 = jax.random.normal(k1, (out_channels, in_channels, kh, kw),
                                    jnp.float32) / jnp.sqrt(in_channels * kh * kw)
        self.w2 = jax.random.normal(k3, (out_channels, out_channels, kw, kh),
                                    jnp.float32) / jnp.sqrt(out_channels * kh * kw)
        # Conv biases exist in the module but are a no-op in front of training-mode BN
        # (mean subtraction cancels them).  The Pallas path drops them; the reference
        # keeps them, so the test also verifies the cancellation.
        self.b1 = jax.random.normal(k2, (out_channels,), jnp.float32) * 0.1
        self.b2 = jax.random.normal(k4, (out_channels,), jnp.float32) * 0.1
        # BatchNorm2d default affine init: weight=1, bias=0.
        self.g1 = jnp.ones((out_channels,), jnp.float32)
        self.be1 = jnp.zeros((out_channels,), jnp.float32)
        self.g2 = jnp.ones((out_channels,), jnp.float32)
        self.be2 = jnp.zeros((out_channels,), jnp.float32)
        self.kernel_size = (kh, kw)
        self.stride = stride if isinstance(stride, int) else stride[0]
        self.padding = tuple(padding)

    def __call__(self, x):
        return _block_forward(x, self.w1, self.g1, self.be1,
                              self.w2, self.g2, self.be2,
                              kernel_size=self.kernel_size, stride=self.stride,
                              padding=self.padding)


def _ref_forward(x, blk, matmul_dtype):
    """Plain-JAX reference of the PyTorch module (training-mode BN, conv bias kept).

    matmul_dtype=float32 -> exact f32 spec; matmul_dtype=MATMUL_DTYPE -> same matmul-input
    rounding as the Pallas path (tight algorithmic check).
    """
    def conv(h, w, b, stride, pad):
        out = jax.lax.conv_general_dilated(
            h.astype(matmul_dtype), w.astype(matmul_dtype),
            window_strides=(stride, stride),
            padding=[(pad[0], pad[0]), (pad[1], pad[1])],
            dimension_numbers=("NCHW", "OIHW", "NCHW"),
            preferred_element_type=jnp.float32)
        return out + b[None, :, None, None]

    def bn_relu(h, g, bt):
        mean = h.mean(axis=(0, 2, 3), keepdims=True)
        var = ((h - mean) ** 2).mean(axis=(0, 2, 3), keepdims=True)
        y = (h - mean) * jax.lax.rsqrt(var + _BN_EPS)
        y = y * g[None, :, None, None] + bt[None, :, None, None]
        return jnp.maximum(y, 0.0)

    kh, kw = blk.kernel_size
    ph, pw = blk.padding
    s = blk.stride
    h = bn_relu(conv(x, blk.w1, blk.b1, s, (ph, pw)), blk.g1, blk.be1)
    return bn_relu(conv(h, blk.w2, blk.b2, s, (pw, ph)), blk.g2, blk.be2)


def _check(x, blk):
    out = jax.block_until_ready(blk(x))
    ref_matched = _ref_forward(x, blk, MATMUL_DTYPE)   # same matmul-input precision
    ref_f32 = _ref_forward(x, blk, jnp.float32)        # exact f32 module
    assert out.shape == ref_f32.shape, (out.shape, ref_f32.shape)
    err_matched = float(jnp.max(jnp.abs(out - ref_matched)))
    err_f32 = float(jnp.max(jnp.abs(out - ref_f32)))
    assert err_matched < 2e-2, err_matched
    assert err_f32 < 1.5e-1, err_f32   # slack for bf16 MXU inputs vs the pure-f32 spec


if __name__ == "__main__":
    key = jax.random.PRNGKey(0)
    kx, kp = jax.random.split(key)
    blk = BasicConvBlockPallas(in_channels=4, out_channels=8,
                               kernel_size=(3, 1), stride=1, padding=(1, 0), key=kp)

    x = jax.random.normal(kx, (2, 4, 16, 16), jnp.float32)
    _check(x, blk)                                                    # M = 512

    kx2, kx3 = jax.random.split(kx)
    _check(jax.random.normal(kx2, (2, 4, 32, 16), jnp.float32), blk)  # M = 1024: 2 tiles,
                                                                      # streaming BN stats
    _check(jax.random.normal(kx3, (1, 4, 6, 10), jnp.float32), blk)   # M = 60: padded /
                                                                      # masked lane tail
    print("KERNEL_OK")
</pallas_src>

<mosaic_0001>
module attributes {stable_mosaic.version = 11 : i64} {
  func.func @_bn_relu_kernel(%arg0: i32, %arg1: memref<8x512xf32, #tpu.memory_space<vmem>>, %arg2: memref<8x1xf32, #tpu.memory_space<vmem>>, %arg3: memref<8x1xf32, #tpu.memory_space<vmem>>, %arg4: memref<8x512xbf16, #tpu.memory_space<vmem>>) attributes {dimension_semantics = [#tpu.dimension_semantics<parallel>], iteration_bounds = array<i64: 1>, scalar_prefetch = 0 : i64, scratch_operands = 0 : i64, tpu.core_type = #tpu.core_type<tc>, window_params = [{transform_indices = @transform_0, window_bounds = array<i64: 8, 512>}, {pipeline_mode = #tpu.pipeline_mode<synchronous>, transform_indices = @transform_1, window_bounds = array<i64: 8, 1>}, {pipeline_mode = #tpu.pipeline_mode<synchronous>, transform_indices = @transform_2, window_bounds = array<i64: 8, 1>}, {transform_indices = @transform_3, window_bounds = array<i64: 8, 512>}]} {
    %c0 = arith.constant 0 : index
    %c0_0 = arith.constant 0 : index
    %0 = vector.load %arg1[%c0, %c0_0] : memref<8x512xf32, #tpu.memory_space<vmem>>, vector<8x512xf32>
    %c0_1 = arith.constant 0 : index
    %c0_2 = arith.constant 0 : index
    %1 = vector.load %arg2[%c0_1, %c0_2] : memref<8x1xf32, #tpu.memory_space<vmem>>, vector<8x1xf32>
    %2 = vector.broadcast %1 : vector<8x1xf32> to vector<8x512xf32>
    %3 = arith.mulf %0, %2 : vector<8x512xf32>
    %c0_3 = arith.constant 0 : index
    %c0_4 = arith.constant 0 : index
    %4 = vector.load %arg3[%c0_3, %c0_4] : memref<8x1xf32, #tpu.memory_space<vmem>>, vector<8x1xf32>
    %5 = vector.broadcast %4 : vector<8x1xf32> to vector<8x512xf32>
    %6 = arith.addf %3, %5 : vector<8x512xf32>
    %cst = arith.constant 0.000000e+00 : f32
    %7 = vector.broadcast %cst : f32 to vector<8x512xf32>
    %8 = arith.maximumf %6, %7 : vector<8x512xf32>
    %9 = arith.truncf %8 : vector<8x512xf32> to vector<8x512xbf16>
    %c0_5 = arith.constant 0 : index
    %c0_6 = arith.constant 0 : index
    %10 = vector.load %arg4[%c0_5, %c0_6] : memref<8x512xbf16, #tpu.memory_space<vmem>>, vector<8x512xbf16>
    tpu.vector_store %arg4[%c0_5, %c0_6], %9 {strides = array<i32>} : memref<8x512xbf16, #tpu.memory_space<vmem>>, vector<8x512xbf16>,
    return
  }
  func.func @transform_0(%arg0: i32) -> (i32, i32) {
    %c0_i32 = arith.constant 0 : i32
    %c0_i32_0 = arith.constant 0 : i32
    return %c0_i32, %arg0 : i32, i32
  }
  func.func @transform_1(%arg0: i32) -> (i32, i32) {
    %c0_i32 = arith.constant 0 : i32
    %c0_i32_0 = arith.constant 0 : i32
    %c0_i32_1 = arith.constant 0 : i32
    return %c0_i32, %c0_i32_0 : i32, i32
  }
  func.func @transform_2(%arg0: i32) -> (i32, i32) {
    %c0_i32 = arith.constant 0 : i32
    %c0_i32_0 = arith.constant 0 : i32
    %c0_i32_1 = arith.constant 0 : i32
    return %c0_i32, %c0_i32_0 : i32, i32
  }
  func.func @transform_3(%arg0: i32) -> (i32, i32) {
    %c0_i32 = arith.constant 0 : i32
    %c0_i32_0 = arith.constant 0 : i32
    return %c0_i32, %arg0 : i32, i32
  }
}

module attributes {stable_mosaic.version = 11 : i64} {
  func.func @_conv_stats_kernel(%arg0: i32, %arg1: memref<12x512xbf16, #tpu.memory_space<vmem>>, %arg2: memref<8x12xbf16, #tpu.memory_space<vmem>>, %arg3: memref<8x1xf32, #tpu.memory_space<vmem>>, %arg4: memref<8x1xf32, #tpu.memory_space<vmem>>, %arg5: memref<8x512xf32, #tpu.memory_space<vmem>>, %arg6: memref<8x1xf32, #tpu.memory_space<vmem>>, %arg7: memref<8x1xf32, #tpu.memory_space<vmem>>, %arg8: memref<8x1xf32, #tpu.memory_space<vmem>>, %arg9: memref<8x1xf32, #tpu.memory_space<vmem>>) attributes {dimension_semantics = [#tpu.dimension_semantics<arbitrary>], iteration_bounds = array<i64: 1>, scalar_prefetch = 0 : i64, scratch_operands = 2 : i64, tpu.core_type = #tpu.core_type<tc>, window_params = [{transform_indices = @transform_0, window_bounds = array<i64: 12, 512>}, {pipeline_mode = #tpu.pipeline_mode<synchronous>, transform_indices = @transform_1, window_bounds = array<i64: 8, 12>}, {pipeline_mode = #tpu.pipeline_mode<synchronous>, transform_indices = @transform_2, window_bounds = array<i64: 8, 1>}, {pipeline_mode = #tpu.pipeline_mode<synchronous>, transform_indices = @transform_3, window_bounds = array<i64: 8, 1>}, {transform_indices = @transform_4, window_bounds = array<i64: 8, 512>}, {pipeline_mode = #tpu.pipeline_mode<synchronous>, transform_indices = @transform_5, window_bounds = array<i64: 8, 1>}, {pipeline_mode = #tpu.pipeline_mode<synchronous>, transform_indices = @transform_6, window_bounds = array<i64: 8, 1>}]} {
    %c0_i32 = arith.constant 0 : i32
    %0 = arith.cmpi eq, %arg0, %c0_i32 : i32
    %1 = arith.extui %0 : i1 to i32
    %c0_i32_0 = arith.constant 0 : i32
    %2 = arith.cmpi ne, %1, %c0_i32_0 : i32
    scf.if %2 {
      %cst_18 = arith.constant 0.000000e+00 : f32
      %21 = vector.broadcast %cst_18 : f32 to vector<8x1xf32>
      %c0_19 = arith.constant 0 : index
      %c0_20 = arith.constant 0 : index
      %22 = vector.load %arg8[%c0_19, %c0_20] : memref<8x1xf32, #tpu.memory_space<vmem>>, vector<8x1xf32>
      tpu.vector_store %arg8[%c0_19, %c0_20], %21 {strides = array<i32>} : memref<8x1xf32, #tpu.memory_space<vmem>>, vector<8x1xf32>,
      %cst_21 = arith.constant 0.000000e+00 : f32
      %23 = vector.broadcast %cst_21 : f32 to vector<8x1xf32>
      %c0_22 = arith.constant 0 : index
      %c0_23 = arith.constant 0 : index
      %24 = vector.load %arg9[%c0_22, %c0_23] : memref<8x1xf32, #tpu.memory_space<vmem>>, vector<8x1xf32>
      tpu.vector_store %arg9[%c0_22, %c0_23], %23 {strides = array<i32>} : memref<8x1xf32, #tpu.memory_space<vmem>>, vector<8x1xf32>,
    } else {
    }
    %c0 = arith.constant 0 : index
    %c0_1 = arith.constant 0 : index
    %3 = vector.load %arg2[%c0, %c0_1] : memref<8x12xbf16, #tpu.memory_space<vmem>>, vector<8x12xbf16>
    %c0_2 = arith.constant 0 : index
    %c0_3 = arith.constant 0 : index
    %4 = vector.load %arg1[%c0_2, %c0_3] : memref<12x512xbf16, #tpu.memory_space<vmem>>, vector<12x512xbf16>
    %cst = arith.constant dense<0.000000e+00> : vector<8x512xf32>
    %5 = tpu.matmul %3, %4, %cst {dimension_numbers = #tpu.dot_dimension_numbers<[1], [0], [0], [1], [0, 0, 1, 1], [], []>} : vector<8x12xbf16>, vector<12x512xbf16>, vector<8x512xf32> -> vector<8x512xf32>
    %c0_4 = arith.constant 0 : index
    %c0_5 = arith.constant 0 : index
    %6 = vector.load %arg5[%c0_4, %c0_5] : memref<8x512xf32, #tpu.memory_space<vmem>>, vector<8x512xf32>
    tpu.vector_store %arg5[%c0_4, %c0_5], %5 {strides = array<i32>} : memref<8x512xf32, #tpu.memory_space<vmem>>, vector<8x512xf32>,
    %c0_6 = arith.constant 0 : index
    %c0_7 = arith.constant 0 : index
    %7 = vector.load %arg8[%c0_6, %c0_7] : memref<8x1xf32, #tpu.memory_space<vmem>>, vector<8x1xf32>
    %cst_8 = arith.constant dense<0.000000e+00> : vector<8xf32>
    %8 = vector.multi_reduction <add>, %5, %cst_8 [1] : vector<8x512xf32> to vector<8xf32>
    %9 = vector.shape_cast %8 : vector<8xf32> to vector<8x1xf32>
    %10 = arith.addf %7, %9 : vector<8x1xf32>
    %c0_9 = arith.constant 0 : index
    %c0_10 = arith.constant 0 : index
    %11 = vector.load %arg8[%c0_9, %c0_10] : memref<8x1xf32, #tpu.memory_space<vmem>>, vector<8x1xf32>
    tpu.vector_store %arg8[%c0_9, %c0_10], %10 {strides = array<i32>} : memref<8x1xf32, #tpu.memory_space<vmem>>, vector<8x1xf32>,
    %c0_11 = arith.constant 0 : index
    %c0_12 = arith.constant 0 : index
    %12 = vector.load %arg9[%c0_11, %c0_12] : memref<8x1xf32, #tpu.memory_space<vmem>>, vector<8x1xf32>
    %13 = arith.mulf %5, %5 : vector<8x512xf32>
    %cst_13 = arith.constant dense<0.000000e+00> : vector<8xf32>
    %14 = vector.multi_reduction <add>, %13, %cst_13 [1] : vector<8x512xf32> to vector<8xf32>
    %15 = vector.shape_cast %14 : vector<8xf32> to vector<8x1xf32>
    %16 = arith.addf %12, %15 : vector<8x1xf32>
    %c0_14 = arith.constant 0 : index
    %c0_15 = arith.constant 0 : index
    %17 = vector.load %arg9[%c0_14, %c0_15] : memref<8x1xf32, #tpu.memory_space<vmem>>, vector<8x1xf32>
    tpu.vector_store %arg9[%c0_14, %c0_15], %16 {strides = array<i32>} : memref<8x1xf32, #tpu.memory_space<vmem>>, vector<8x1xf32>,
    %c0_i32_16 = arith.constant 0 : i32
    %18 = arith.cmpi eq, %arg0, %c0_i32_16 : i32
    %19 = arith.extui %18 : i1 to i32
    %c0_i32_17 = arith.constant 0 : i32
    %20 = arith.cmpi ne, %19, %c0_i32_17 : i32
    scf.if %20 {
      %c0_18 = arith.constant 0 : index
      %c0_19 = arith.constant 0 : index
      %21 = vector.load %arg8[%c0_18, %c0_19] : memref<8x1xf32, #tpu.memory_space<vmem>>, vector<8x1xf32>
      %cst_20 = arith.constant 0.001953125 : f32
      %22 = vector.broadcast %cst_20 : f32 to vector<8x1xf32>
      %23 = arith.mulf %21, %22 : vector<8x1xf32>
      %c0_21 = arith.constant 0 : index
      %c0_22 = arith.constant 0 : index
      %24 = vector.load %arg9[%c0_21, %c0_22] : memref<8x1xf32, #tpu.memory_space<vmem>>, vector<8x1xf32>
      %cst_23 = arith.constant 0.001953125 : f32
      %25 = vector.broadcast %cst_23 : f32 to vector<8x1xf32>
      %26 = arith.mulf %24, %25 : vector<8x1xf32>
      %27 = arith.mulf %23, %23 : vector<8x1xf32>
      %28 = arith.subf %26, %27 : vector<8x1xf32>
      %c0_24 = arith.constant 0 : index
      %c0_25 = arith.constant 0 : index
      %29 = vector.load %arg3[%c0_24, %c0_25] : memref<8x1xf32, #tpu.memory_space<vmem>>, vector<8x1xf32>
      %cst_26 = arith.constant 9.99999974E-6 : f32
      %30 = vector.broadcast %cst_26 : f32 to vector<8x1xf32>
      %31 = arith.addf %28, %30 : vector<8x1xf32>
      %32 = math.rsqrt %31 : vector<8x1xf32>
      %33 = arith.mulf %29, %32 : vector<8x1xf32>
      %c0_27 = arith.constant 0 : index
      %c0_28 = arith.constant 0 : index
      %34 = vector.load %arg6[%c0_27, %c0_28] : memref<8x1xf32, #tpu.memory_space<vmem>>, vector<8x1xf32>
      tpu.vector_store %arg6[%c0_27, %c0_28], %33 {strides = array<i32>} : memref<8x1xf32, #tpu.memory_space<vmem>>, vector<8x1xf32>,
      %c0_29 = arith.constant 0 : index
      %c0_30 = arith.constant 0 : index
      %35 = vector.load %arg4[%c0_29, %c0_30] : memref<8x1xf32, #tpu.memory_space<vmem>>, vector<8x1xf32>
      %36 = arith.mulf %23, %33 : vector<8x1xf32>
      %37 = arith.subf %35, %36 : vector<8x1xf32>
      %c0_31 = arith.constant 0 : index
      %c0_32 = arith.constant 0 : index
      %38 = vector.load %arg7[%c0_31, %c0_32] : memref<8x1xf32, #tpu.memory_space<vmem>>, vector<8x1xf32>
      tpu.vector_store %arg7[%c0_31, %c0_32], %37 {strides = array<i32>} : memref<8x1xf32, #tpu.memory_space<vmem>>, vector<8x1xf32>,
    } else {
    }
    return
  }
  func.func @transform_0(%arg0: i32) -> (i32, i32) {
    %c0_i32 = arith.constant 0 : i32
    %c0_i32_0 = arith.constant 0 : i32
    return %c0_i32, %arg0 : i32, i32
  }
  func.func @transform_1(%arg0: i32) -> (i32, i32) {
    %c0_i32 = arith.constant 0 : i32
    %c0_i32_0 = arith.constant 0 : i32
    %c0_i32_1 = arith.constant 0 : i32
    return %c0_i32, %c0_i32_0 : i32, i32
  }
  func.func @transform_2(%arg0: i32) -> (i32, i32) {
    %c0_i32 = arith.constant 0 : i32
    %c0_i32_0 = arith.constant 0 : i32
    %c0_i32_1 = arith.constant 0 : i32
    return %c0_i32, %c0_i32_0 : i32, i32
  }
  func.func @transform_3(%arg0: i32) -> (i32, i32) {
    %c0_i32 = arith.constant 0 : i32
    %c0_i32_0 = arith.constant 0 : i32
    %c0_i32_1 = arith.constant 0 : i32
    return %c0_i32, %c0_i32_0 : i32, i32
  }
  func.func @transform_4(%arg0: i32) -> (i32, i32) {
    %c0_i32 = arith.constant 0 : i32
    %c0_i32_0 = arith.constant 0 : i32
    return %c0_i32, %arg0 : i32, i32
  }
  func.func @transform_5(%arg0: i32) -> (i32, i32) {
    %c0_i32 = arith.constant 0 : i32
    %c0_i32_0 = arith.constant 0 : i32
    %c0_i32_1 = arith.constant 0 : i32
    return %c0_i32, %c0_i32_0 : i32, i32
  }
  func.func @transform_6(%arg0: i32) -> (i32, i32) {
    %c0_i32 = arith.constant 0 : i32
    %c0_i32_0 = arith.constant 0 : i32
    %c0_i32_1 = arith.constant 0 : i32
    return %c0_i32, %c0_i32_0 : i32, i32
  }
}

module attributes {stable_mosaic.version = 11 : i64} {
  func.func @_bn_relu_kernel(%arg0: i32, %arg1: memref<8x512xf32, #tpu.memory_space<vmem>>, %arg2: memref<8x1xf32, #tpu.memory_space<vmem>>, %arg3: memref<8x1xf32, #tpu.memory_space<vmem>>, %arg4: memref<8x512xf32, #tpu.memory_space<vmem>>) attributes {dimension_semantics = [#tpu.dimension_semantics<parallel>], iteration_bounds = array<i64: 1>, scalar_prefetch = 0 : i64, scratch_operands = 0 : i64, tpu.core_type = #tpu.core_type<tc>, window_params = [{transform_indices = @transform_0, window_bounds = array<i64: 8, 512>}, {pipeline_mode = #tpu.pipeline_mode<synchronous>, transform_indices = @transform_1, window_bounds = array<i64: 8, 1>}, {pipeline_mode = #tpu.pipeline_mode<synchronous>, transform_indices = @transform_2, window_bounds = array<i64: 8, 1>}, {transform_indices = @transform_3, window_bounds = array<i64: 8, 512>}]} {
    %c0 = arith.constant 0 : index
    %c0_0 = arith.constant 0 : index
    %0 = vector.load %arg1[%c0, %c0_0] : memref<8x512xf32, #tpu.memory_space<vmem>>, vector<8x512xf32>
    %c0_1 = arith.constant 0 : index
    %c0_2 = arith.constant 0 : index
    %1 = vector.load %arg2[%c0_1, %c0_2] : memref<8x1xf32, #tpu.memory_space<vmem>>, vector<8x1xf32>
    %2 = vector.broadcast %1 : vector<8x1xf32> to vector<8x512xf32>
    %3 = arith.mulf %0, %2 : vector<8x512xf32>
    %c0_3 = arith.constant 0 : index
    %c0_4 = arith.constant 0 : index
    %4 = vector.load %arg3[%c0_3, %c0_4] : memref<8x1xf32, #tpu.memory_space<vmem>>, vector<8x1xf32>
    %5 = vector.broadcast %4 : vector<8x1xf32> to vector<8x512xf32>
    %6 = arith.addf %3, %5 : vector<8x512xf32>
    %cst = arith.constant 0.000000e+00 : f32
    %7 = vector.broadcast %cst : f32 to vector<8x512xf32>
    %8 = arith.maximumf %6, %7 : vector<8x512xf32>
    %c0_5 = arith.constant 0 : index
    %c0_6 = arith.constant 0 : index
    %9 = vector.load %arg4[%c0_5, %c0_6] : memref<8x512xf32, #tpu.memory_space<vmem>>, vector<8x512xf32>
    tpu.vector_store %arg4[%c0_5, %c0_6], %8 {strides = array<i32>} : memref<8x512xf32, #tpu.memory_space<vmem>>, vector<8x512xf32>,
    return
  }
  func.func @transform_0(%arg0: i32) -> (i32, i32) {
    %c0_i32 = arith.constant 0 : i32
    %c0_i32_0 = arith.constant 0 : i32
    return %c0_i32, %arg0 : i32, i32
  }
  func.func @transform_1(%arg0: i32) -> (i32, i32) {
    %c0_i32 = arith.constant 0 : i32
    %c0_i32_0 = arith.constant 0 : i32
    %c0_i32_1 = arith.constant 0 : i32
    return %c0_i32, %c0_i32_0 : i32, i32
  }
  func.func @transform_2(%arg0: i32) -> (i32, i32) {
    %c0_i32 = arith.constant 0 : i32
    %c0_i32_0 = arith.constant 0 : i32
    %c0_i32_1 = arith.constant 0 : i32
    return %c0_i32, %c0_i32_0 : i32, i32
  }
  func.func @transform_3(%arg0: i32) -> (i32, i32) {
    %c0_i32 = arith.constant 0 : i32
    %c0_i32_0 = arith.constant 0 : i32
    return %c0_i32, %arg0 : i32, i32
  }
}

module attributes {stable_mosaic.version = 11 : i64} {
  func.func @_conv_stats_kernel(%arg0: i32, %arg1: memref<24x512xbf16, #tpu.memory_space<vmem>>, %arg2: memref<8x24xbf16, #tpu.memory_space<vmem>>, %arg3: memref<8x1xf32, #tpu.memory_space<vmem>>, %arg4: memref<8x1xf32, #tpu.memory_space<vmem>>, %arg5: memref<8x512xf32, #tpu.memory_space<vmem>>, %arg6: memref<8x1xf32, #tpu.memory_space<vmem>>, %arg7: memref<8x1xf32, #tpu.memory_space<vmem>>, %arg8: memref<8x1xf32, #tpu.memory_space<vmem>>, %arg9: memref<8x1xf32, #tpu.memory_space<vmem>>) attributes {dimension_semantics = [#tpu.dimension_semantics<arbitrary>], iteration_bounds = array<i64: 1>, scalar_prefetch = 0 : i64, scratch_operands = 2 : i64, tpu.core_type = #tpu.core_type<tc>, window_params = [{transform_indices = @transform_0, window_bounds = array<i64: 24, 512>}, {pipeline_mode = #tpu.pipeline_mode<synchronous>, transform_indices = @transform_1, window_bounds = array<i64: 8, 24>}, {pipeline_mode = #tpu.pipeline_mode<synchronous>, transform_indices = @transform_2, window_bounds = array<i64: 8, 1>}, {pipeline_mode = #tpu.pipeline_mode<synchronous>, transform_indices = @transform_3, window_bounds = array<i64: 8, 1>}, {transform_indices = @transform_4, window_bounds = array<i64: 8, 512>}, {pipeline_mode = #tpu.pipeline_mode<synchronous>, transform_indices = @transform_5, window_bounds = array<i64: 8, 1>}, {pipeline_mode = #tpu.pipeline_mode<synchronous>, transform_indices = @transform_6, window_bounds = array<i64: 8, 1>}]} {
    %c0_i32 = arith.constant 0 : i32
    %0 = arith.cmpi eq, %arg0, %c0_i32 : i32
    %1 = arith.extui %0 : i1 to i32
    %c0_i32_0 = arith.constant 0 : i32
    %2 = arith.cmpi ne, %1, %c0_i32_0 : i32
    scf.if %2 {
      %cst_18 = arith.constant 0.000000e+00 : f32
      %21 = vector.broadcast %cst_18 : f32 to vector<8x1xf32>
      %c0_19 = arith.constant 0 : index
      %c0_20 = arith.constant 0 : index
      %22 = vector.load %arg8[%c0_19, %c0_20] : memref<8x1xf32, #tpu.memory_space<vmem>>, vector<8x1xf32>
      tpu.vector_store %arg8[%c0_19, %c0_20], %21 {strides = array<i32>} : memref<8x1xf32, #tpu.memory_space<vmem>>, vector<8x1xf32>,
      %cst_21 = arith.constant 0.000000e+00 : f32
      %23 = vector.broadcast %cst_21 : f32 to vector<8x1xf32>
      %c0_22 = arith.constant 0 : index
      %c0_23 = arith.constant 0 : index
      %24 = vector.load %arg9[%c0_22, %c0_23] : memref<8x1xf32, #tpu.memory_space<vmem>>, vector<8x1xf32>
      tpu.vector_store %arg9[%c0_22, %c0_23], %23 {strides = array<i32>} : memref<8x1xf32, #tpu.memory_space<vmem>>, vector<8x1xf32>,
    } else {
    }
    %c0 = arith.constant 0 : index
    %c0_1 = arith.constant 0 : index
    %3 = vector.load %arg2[%c0, %c0_1] : memref<8x24xbf16, #tpu.memory_space<vmem>>, vector<8x24xbf16>
    %c0_2 = arith.constant 0 : index
    %c0_3 = arith.constant 0 : index
    %4 = vector.load %arg1[%c0_2, %c0_3] : memref<24x512xbf16, #tpu.memory_space<vmem>>, vector<24x512xbf16>
    %cst = arith.constant dense<0.000000e+00> : vector<8x512xf32>
    %5 = tpu.matmul %3, %4, %cst {dimension_numbers = #tpu.dot_dimension_numbers<[1], [0], [0], [1], [0, 0, 1, 1], [], []>} : vector<8x24xbf16>, vector<24x512xbf16>, vector<8x512xf32> -> vector<8x512xf32>
    %c0_4 = arith.constant 0 : index
    %c0_5 = arith.constant 0 : index
    %6 = vector.load %arg5[%c0_4, %c0_5] : memref<8x512xf32, #tpu.memory_space<vmem>>, vector<8x512xf32>
    tpu.vector_store %arg5[%c0_4, %c0_5], %5 {strides = array<i32>} : memref<8x512xf32, #tpu.memory_space<vmem>>, vector<8x512xf32>,
    %c0_6 = arith.constant 0 : index
    %c0_7 = arith.constant 0 : index
    %7 = vector.load %arg8[%c0_6, %c0_7] : memref<8x1xf32, #tpu.memory_space<vmem>>, vector<8x1xf32>
    %cst_8 = arith.constant dense<0.000000e+00> : vector<8xf32>
    %8 = vector.multi_reduction <add>, %5, %cst_8 [1] : vector<8x512xf32> to vector<8xf32>
    %9 = vector.shape_cast %8 : vector<8xf32> to vector<8x1xf32>
    %10 = arith.addf %7, %9 : vector<8x1xf32>
    %c0_9 = arith.constant 0 : index
    %c0_10 = arith.constant 0 : index
    %11 = vector.load %arg8[%c0_9, %c0_10] : memref<8x1xf32, #tpu.memory_space<vmem>>, vector<8x1xf32>
    tpu.vector_store %arg8[%c0_9, %c0_10], %10 {strides = array<i32>} : memref<8x1xf32, #tpu.memory_space<vmem>>, vector<8x1xf32>,
    %c0_11 = arith.constant 0 : index
    %c0_12 = arith.constant 0 : index
    %12 = vector.load %arg9[%c0_11, %c0_12] : memref<8x1xf32, #tpu.memory_space<vmem>>, vector<8x1xf32>
    %13 = arith.mulf %5, %5 : vector<8x512xf32>
    %cst_13 = arith.constant dense<0.000000e+00> : vector<8xf32>
    %14 = vector.multi_reduction <add>, %13, %cst_13 [1] : vector<8x512xf32> to vector<8xf32>
    %15 = vector.shape_cast %14 : vector<8xf32> to vector<8x1xf32>
    %16 = arith.addf %12, %15 : vector<8x1xf32>
    %c0_14 = arith.constant 0 : index
    %c0_15 = arith.constant 0 : index
    %17 = vector.load %arg9[%c0_14, %c0_15] : memref<8x1xf32, #tpu.memory_space<vmem>>, vector<8x1xf32>
    tpu.vector_store %arg9[%c0_14, %c0_15], %16 {strides = array<i32>} : memref<8x1xf32, #tpu.memory_space<vmem>>, vector<8x1xf32>,
    %c0_i32_16 = arith.constant 0 : i32
    %18 = arith.cmpi eq, %arg0, %c0_i32_16 : i32
    %19 = arith.extui %18 : i1 to i32
    %c0_i32_17 = arith.constant 0 : i32
    %20 = arith.cmpi ne, %19, %c0_i32_17 : i32
    scf.if %20 {
      %c0_18 = arith.constant 0 : index
      %c0_19 = arith.constant 0 : index
      %21 = vector.load %arg8[%c0_18, %c0_19] : memref<8x1xf32, #tpu.memory_space<vmem>>, vector<8x1xf32>
      %cst_20 = arith.constant 0.001953125 : f32
      %22 = vector.broadcast %cst_20 : f32 to vector<8x1xf32>
      %23 = arith.mulf %21, %22 : vector<8x1xf32>
      %c0_21 = arith.constant 0 : index
      %c0_22 = arith.constant 0 : index
      %24 = vector.load %arg9[%c0_21, %c0_22] : memref<8x1xf32, #tpu.memory_space<vmem>>, vector<8x1xf32>
      %cst_23 = arith.constant 0.001953125 : f32
      %25 = vector.broadcast %cst_23 : f32 to vector<8x1xf32>
      %26 = arith.mulf %24, %25 : vector<8x1xf32>
      %27 = arith.mulf %23, %23 : vector<8x1xf32>
      %28 = arith.subf %26, %27 : vector<8x1xf32>
      %c0_24 = arith.constant 0 : index
      %c0_25 = arith.constant 0 : index
      %29 = vector.load %arg3[%c0_24, %c0_25] : memref<8x1xf32, #tpu.memory_space<vmem>>, vector<8x1xf32>
      %cst_26 = arith.constant 9.99999974E-6 : f32
      %30 = vector.broadcast %cst_26 : f32 to vector<8x1xf32>
      %31 = arith.addf %28, %30 : vector<8x1xf32>
      %32 = math.rsqrt %31 : vector<8x1xf32>
      %33 = arith.mulf %29, %32 : vector<8x1xf32>
      %c0_27 = arith.constant 0 : index
      %c0_28 = arith.constant 0 : index
      %34 = vector.load %arg6[%c0_27, %c0_28] : memref<8x1xf32, #tpu.memory_space<vmem>>, vector<8x1xf32>
      tpu.vector_store %arg6[%c0_27, %c0_28], %33 {strides = array<i32>} : memref<8x1xf32, #tpu.memory_space<vmem>>, vector<8x1xf32>,
      %c0_29 = arith.constant 0 : index
      %c0_30 = arith.constant 0 : index
      %35 = vector.load %arg4[%c0_29, %c0_30] : memref<8x1xf32, #tpu.memory_space<vmem>>, vector<8x1xf32>
      %36 = arith.mulf %23, %33 : vector<8x1xf32>
      %37 = arith.subf %35, %36 : vector<8x1xf32>
      %c0_31 = arith.constant 0 : index
      %c0_32 = arith.constant 0 : index
      %38 = vector.load %arg7[%c0_31, %c0_32] : memref<8x1xf32, #tpu.memory_space<vmem>>, vector<8x1xf32>
      tpu.vector_store %arg7[%c0_31, %c0_32], %37 {strides = array<i32>} : memref<8x1xf32, #tpu.memory_space<vmem>>, vector<8x1xf32>,
    } else {
    }
    return
  }
  func.func @transform_0(%arg0: i32) -> (i32, i32) {
    %c0_i32 = arith.constant 0 : i32
    %c0_i32_0 = arith.constant 0 : i32
    return %c0_i32, %arg0 : i32, i32
  }
  func.func @transform_1(%arg0: i32) -> (i32, i32) {
    %c0_i32 = arith.constant 0 : i32
    %c0_i32_0 = arith.constant 0 : i32
    %c0_i32_1 = arith.constant 0 : i32
    return %c0_i32, %c0_i32_0 : i32, i32
  }
  func.func @transform_2(%arg0: i32) -> (i32, i32) {
    %c0_i32 = arith.constant 0 : i32
    %c0_i32_0 = arith.constant 0 : i32
    %c0_i32_1 = arith.constant 0 : i32
    return %c0_i32, %c0_i32_0 : i32, i32
  }
  func.func @transform_3(%arg0: i32) -> (i32, i32) {
    %c0_i32 = arith.constant 0 : i32
    %c0_i32_0 = arith.constant 0 : i32
    %c0_i32_1 = arith.constant 0 : i32
    return %c0_i32, %c0_i32_0 : i32, i32
  }
  func.func @transform_4(%arg0: i32) -> (i32, i32) {
    %c0_i32 = arith.constant 0 : i32
    %c0_i32_0 = arith.constant 0 : i32
    return %c0_i32, %arg0 : i32, i32
  }
  func.func @transform_5(%arg0: i32) -> (i32, i32) {
    %c0_i32 = arith.constant 0 : i32
    %c0_i32_0 = arith.constant 0 : i32
    %c0_i32_1 = arith.constant 0 : i32
    return %c0_i32, %c0_i32_0 : i32, i32
  }
  func.func @transform_6(%arg0: i32) -> (i32, i32) {
    %c0_i32 = arith.constant 0 : i32
    %c0_i32_0 = arith.constant 0 : i32
    %c0_i32_1 = arith.constant 0 : i32
    return %c0_i32, %c0_i32_0 : i32, i32
  }
}

</mosaic_0001>

<bundles_post_ra>
// kernel: _block_forward.4
= control target key start
LH: loop header
LB: loop body
LE: loop exit
PB: predicated region body
PF: predicated region fallthrough
CT: control target
= control target key end

     0   :  { %vm53_vm0 = vcmask 1045504   ;;  %v221_v1 = vmov 0   ;;  %vm49_vm1 = vcmask 97280   ;;  %vm25_vm2 = vcmask 7168   ;;  %s303_s0 = inlined_call_operand.vmem [shape: bf16[12,512], index: 0, kind: input, shape index: {}]   ;;  %s304_s1 = inlined_call_operand.vmem [shape: bf16[8,12], index: 1, kind: input, shape index: {}]   ;;  %s305_s4 = inlined_call_operand.vmem [shape: f32[8,512], index: 4, kind: output, shape index: {0}]   ;;  %s306_s2 = inlined_call_operand.vmem [shape: f32[8,1], index: 2, kind: input, shape index: {}]   ;;  %s307_s3 = inlined_call_operand.vmem [shape: f32[8,1], index: 3, kind: input, shape index: {}]   ;;  %s308_s5 = inlined_call_operand.vmem [shape: f32[8,1], index: 5, kind: output, shape index: {1}]   ;;  %s309_s6 = inlined_call_operand.vmem [shape: f32[8,1], index: 6, kind: output, shape index: {2}]  }
   0x1   :  { %v213_v0 = vld [vmem:[%s303_s0 + $0x4] ss:$16 sps:$4 sm:$0x3f]   ;;  %98 = vmatprep.mubr.bf16.mxu0 %v221_v1  ;;  %139 = vmatprep.mubr.bf16.mxu1 %v221_v1  ;;  %v215_v2 = vld [vmem:[%s303_s0 + $0xc] ss:$16 sps:$4 sm:$0x3f]  }
   0x2   :  { %207 = vmatprep.subr.msk.bf16.mxu0 %vm53_vm0, %v213_v0  ;;  %v217_v3 = vld [vmem:[%s303_s0] ss:$16 sps:$4 sm:$0x3f]   ;;  %v218_v4 = vld [vmem:[%s303_s0 + $0x8] ss:$16 sps:$4 sm:$0x3f]   ;;  %209 = vmatprep.subr.msk.bf16.mxu1 %vm53_vm0, %v215_v2 }
   0x3   :  { %v55_v5 = vsel %vm53_vm0, %v217_v3, 0  ;;  %v61_v6 = vsel %vm53_vm0, %v218_v4, 0  ;;  %v28_v7 = vld [vmem:[%s304_s1] sm:$0xf]  ;;  %v222_v8 = vmov 0.0  }
   0x4   :  { %81 = vmatpush1.bf16.msra.mxu0 %v55_v5  ;;  %122 = vmatpush1.bf16.msra.mxu1 %v61_v6  ;;  %26 = vst.msk [vmem:[#allocation2] sm:$0xff] %vm25_vm2, %v222_v8  ;;  %27 = vst.msk [vmem:[#allocation3] sm:$0xff] %vm25_vm2, %v222_v8  ;;  %v182_v40 = vld [vmem:[%s306_s2] sm:$0xff] }
   0x5   :  { %v187_v43 = vld [vmem:[%s307_s3] sm:$0xff] }
   0x7   :  { %208 = vmatmul.mubr.msk.bf16.vlgmr.msra.gmra.mxu0 %vm49_vm1, %v28_v7  ;;  %210 = vmatmul.mubr.msk.bf16.vlgmr.msra.gmra.mxu1 %vm49_vm1, %v28_v7 }
   0xb   :  { %v152_v27 = vld [vmem:[#allocation2] sm:$0xff]  ;;  %v161_v30 = vld [vmem:[#allocation3] sm:$0xff] }
  0xc7   :  { %v100_v9 = vpop.f32.mrf.mxu0  ;;  %v141_v10 = vpop.f32.mrf.mxu1 }
  0xc8   :  { %148 = vst [vmem:[%s305_s4] sm:$0xff] %v100_v9  ;;  %150 = vst [vmem:[%s305_s4 + $0x10] sm:$0xff] %v141_v10  ;;  %v162_v13 = vmul.f32 %v100_v9, %v100_v9  ;;  %v164_v14 = vmul.f32 %v141_v10, %v141_v10 }
  0xc9   :  { %v102_v11 = vpop.f32.mrf.mxu0  ;;  %v143_v12 = vpop.f32.mrf.mxu1 }
  0xca   :  { %149 = vst [vmem:[%s305_s4 + $0x8] sm:$0xff] %v102_v11  ;;  %v153_v15 = vadd.f32 %v102_v11, %v100_v9  ;;  %v163_v16 = vmul.f32 %v102_v11, %v102_v11  ;;  %151 = vst [vmem:[%s305_s4 + $0x18] sm:$0xff] %v143_v12  ;;  %v165_v25 = vmul.f32 %v143_v12, %v143_v12 }
  0xcb   :  { %v104_v17 = vpop.f32.mrf.mxu0  ;;  %v145_v18 = vpop.f32.mrf.mxu1 }
  0xcc   :  { %v154_v19 = vadd.f32 %v153_v15, %v141_v10  ;;  %v166_v20 = vadd.f32 %v163_v16, %v162_v13 }
  0xcd   :  { %v105_v21 = vpop.f32.mrf.mxu0  ;;  %v146_v22 = vpop.f32.mrf.mxu1 }
  0xce   :  { %v155_v23 = vadd.f32 %v154_v19, %v143_v12  ;;  %v167_v24 = vadd.f32 %v166_v20, %v164_v14 }
  0xd0   :  { %156 = vadd.xlane.f32.xlu0 %v155_v23  ;;  %v168_v26 = vadd.f32 %v167_v24, %v165_v25 }
  0xd4   :  { %169 = vadd.xlane.f32.xlu0 %v168_v26 }
 0x159   :  { %v157_v28 = vpop.xlane.xlu0 %156 }
 0x15a   :  { %v158_v29 = vadd.f32 %v157_v28, %v152_v27 }
 0x15c   :  { %160 = vst.msk [vmem:[#allocation2] sm:$0xff] %vm25_vm2, %v158_v29 }
 0x15d   :  { %v170_v31 = vpop.xlane.xlu0 %169 }
 0x15e   :  { %v171_v32 = vadd.f32 %v170_v31, %v161_v30 }
 0x160   :  { %172 = vst.msk [vmem:[#allocation3] sm:$0xff] %vm25_vm2, %v171_v32 }
 0x163   :  { %v176_v33 = vld [vmem:[#allocation2] sm:$0xff] }
 0x164   :  { %v177_v34 = vmul.f32 0.001953125, %v176_v33 }
 0x166   :  { %v180_v36 = vmul.f32 %v177_v34, %v177_v34 }
 0x167   :  { %v178_v35 = vld [vmem:[#allocation3] sm:$0xff] }
 0x168   :  { %v179_v37 = vmul.f32 0.001953125, %v178_v35 }
 0x16a   :  { %v181_v38 = vsub.f32 %v179_v37, %v180_v36 }
 0x16c   :  { %v183_v39 = vadd.f32 1e-05, %v181_v38 }
 0x16e   :  { %219 = vrsqrt.f32 %v183_v39 }
 0x17b   :  { %v220_v41 = vpop.eup %219 }
 0x17c   :  { %v185_v42 = vmul.f32 %v220_v41, %v182_v40 }
 0x17e   :  { %186 = vst.msk [vmem:[%s308_s5] sm:$0xff] %vm25_vm2, %v185_v42  ;;  %v188_v44 = vmul.f32 %v185_v42, %v177_v34 }
 0x180   :  { %v189_v45 = vsub.f32 %v187_v43, %v188_v44 }
 0x182   :  { %190 = vst.msk [vmem:[%s309_s6] sm:$0xff] %vm25_vm2, %v189_v45 }

// kernel: _block_forward.5
= control target key start
LH: loop header
LB: loop body
LE: loop exit
PB: predicated region body
PF: predicated region fallthrough
CT: control target
= control target key end

     0   :  { %v70_v0 = vmov 0   ;;  %s115_s1 = inlined_call_operand.vmem [shape: f32[8,1], index: 1, kind: input, shape index: {}]   ;;  %s116_s2 = inlined_call_operand.vmem [shape: f32[8,1], index: 2, kind: input, shape index: {}]   ;;  %s117_s0 = inlined_call_operand.vmem [shape: f32[8,512], index: 0, kind: input, shape index: {}]   ;;  %s118_s3 = inlined_call_operand.vmem [shape: bf16[8,512], index: 3, kind: output, shape index: {}]  }
   0x1   :  { %69 = vset.pattern.permute.xlu0 %v70_v0  ;;  %v18_v1 = vld [vmem:[%s115_s1] sm:$0xff]  ;;  %v15_v5 = vld [vmem:[%s117_s0 + $0x8] sm:$0xff]  ;;  %v16_v6 = vld [vmem:[%s117_s0 + $0x10] sm:$0xff] }
   0x2   :  { %21 = vperm.xlu0 %69, %v18_v1   ;;  %v28_v2 = vld [vmem:[%s116_s2] sm:$0xff]  ;;  %v17_v7 = vld [vmem:[%s117_s0 + $0x18] sm:$0xff] }
   0x3   :  { %v14_v3 = vld [vmem:[%s117_s0] sm:$0xff] }
   0x6   :  { %31 = vperm.xlu0 %69, %v28_v2  }
  0x7d   :  { %v22_v4 = vpop.permute.xlu0 %21 }
  0x7e   :  { %v24_v8 = vmul.f32 %v22_v4, %v14_v3  ;;  %v25_v9 = vmul.f32 %v22_v4, %v15_v5  ;;  %v26_v10 = vmul.f32 %v22_v4, %v16_v6  ;;  %v27_v11 = vmul.f32 %v22_v4, %v17_v7 }
  0x81   :  { %v32_v12 = vpop.permute.xlu0 %31 }
  0x82   :  { %v34_v13 = vadd.f32 %v32_v12, %v24_v8  ;;  %v35_v14 = vadd.f32 %v32_v12, %v25_v9  ;;  %v36_v15 = vadd.f32 %v32_v12, %v26_v10  ;;  %v37_v16 = vadd.f32 %v32_v12, %v27_v11 }
  0x84   :  { %v38_v17 = vmax.f32 %v34_v13, 0.0  ;;  %v39_v18 = vmax.f32 %v35_v14, 0.0  ;;  %v40_v19 = vmax.f32 %v36_v15, 0.0  ;;  %v41_v20 = vmax.f32 %v37_v16, 0.0 }
  0x86   :  { %v66_v21 = vpack.c.bf16 %v39_v18, %v38_v17  ;;  %v67_v22 = vpack.c.bf16 %v41_v20, %v40_v19 }
  0x88   :  { %58 = vst [vmem:[%s118_s3] sm:$0xff] %v66_v21  ;;  %59 = vst [vmem:[%s118_s3 + $0x8] sm:$0xff] %v67_v22 }

// kernel: _block_forward.7
= control target key start
LH: loop header
LB: loop body
LE: loop exit
PB: predicated region body
PF: predicated region fallthrough
CT: control target
= control target key end

     0   :  { %v52_v0 = vmov 0   ;;  %s103_s1 = inlined_call_operand.vmem [shape: f32[8,1], index: 1, kind: input, shape index: {}]   ;;  %s104_s2 = inlined_call_operand.vmem [shape: f32[8,1], index: 2, kind: input, shape index: {}]   ;;  %s105_s0 = inlined_call_operand.vmem [shape: f32[8,512], index: 0, kind: input, shape index: {}]   ;;  %s106_s3 = inlined_call_operand.vmem [shape: f32[8,512], index: 3, kind: output, shape index: {}]  }
   0x1   :  { %51 = vset.pattern.permute.xlu0 %v52_v0  ;;  %v18_v1 = vld [vmem:[%s103_s1] sm:$0xff]  ;;  %v15_v5 = vld [vmem:[%s105_s0 + $0x8] sm:$0xff]  ;;  %v16_v6 = vld [vmem:[%s105_s0 + $0x10] sm:$0xff] }
   0x2   :  { %21 = vperm.xlu0 %51, %v18_v1   ;;  %v28_v2 = vld [vmem:[%s104_s2] sm:$0xff]  ;;  %v17_v7 = vld [vmem:[%s105_s0 + $0x18] sm:$0xff] }
   0x3   :  { %v14_v3 = vld [vmem:[%s105_s0] sm:$0xff] }
   0x6   :  { %31 = vperm.xlu0 %51, %v28_v2  }
  0x7d   :  { %v22_v4 = vpop.permute.xlu0 %21 }
  0x7e   :  { %v24_v8 = vmul.f32 %v22_v4, %v14_v3  ;;  %v25_v9 = vmul.f32 %v22_v4, %v15_v5  ;;  %v26_v10 = vmul.f32 %v22_v4, %v16_v6  ;;  %v27_v11 = vmul.f32 %v22_v4, %v17_v7 }
  0x81   :  { %v32_v12 = vpop.permute.xlu0 %31 }
  0x82   :  { %v34_v13 = vadd.f32 %v32_v12, %v24_v8  ;;  %v35_v14 = vadd.f32 %v32_v12, %v25_v9  ;;  %v36_v15 = vadd.f32 %v32_v12, %v26_v10  ;;  %v37_v16 = vadd.f32 %v32_v12, %v27_v11 }
  0x84   :  { %v38_v17 = vmax.f32 %v34_v13, 0.0  ;;  %v39_v18 = vmax.f32 %v35_v14, 0.0  ;;  %v40_v19 = vmax.f32 %v36_v15, 0.0  ;;  %v41_v20 = vmax.f32 %v37_v16, 0.0 }
  0x86   :  { %42 = vst [vmem:[%s106_s3] sm:$0xff] %v38_v17  ;;  %43 = vst [vmem:[%s106_s3 + $0x8] sm:$0xff] %v39_v18 }
  0x87   :  { %44 = vst [vmem:[%s106_s3 + $0x10] sm:$0xff] %v40_v19  ;;  %45 = vst [vmem:[%s106_s3 + $0x18] sm:$0xff] %v41_v20 }

// kernel: _block_forward.6
= control target key start
LH: loop header
LB: loop body
LE: loop exit
PB: predicated region body
PF: predicated region fallthrough
CT: control target
= control target key end

     0   :  { %vm69_vm0 = vcmask 1043456   ;;  %v245_v2 = vmov 0   ;;  %vm65_vm1 = vcmask 195584   ;;  %vm25_vm2 = vcmask 7168   ;;  %s333_s0 = inlined_call_operand.vmem [shape: bf16[24,512], index: 0, kind: input, shape index: {}]   ;;  %s334_s1 = inlined_call_operand.vmem [shape: bf16[8,24], index: 1, kind: input, shape index: {}]   ;;  %s335_s4 = inlined_call_operand.vmem [shape: f32[8,512], index: 4, kind: output, shape index: {0}]   ;;  %s336_s2 = inlined_call_operand.vmem [shape: f32[8,1], index: 2, kind: input, shape index: {}]   ;;  %s337_s3 = inlined_call_operand.vmem [shape: f32[8,1], index: 3, kind: input, shape index: {}]   ;;  %s338_s5 = inlined_call_operand.vmem [shape: f32[8,1], index: 5, kind: output, shape index: {1}]   ;;  %s339_s6 = inlined_call_operand.vmem [shape: f32[8,1], index: 6, kind: output, shape index: {2}]  }
   0x1   :  { %v33_v0 = vld [vmem:[%s333_s0 + $0x20] sm:$0xff]  ;;  %v34_v1 = vld [vmem:[%s333_s0 + $0x28] sm:$0xff]  ;;  %114 = vmatprep.mubr.bf16.mxu0 %v245_v2  ;;  %155 = vmatprep.mubr.bf16.mxu1 %v245_v2  ;;  %v246_v14 = vmov 0.0  }
   0x2   :  { %v224_v3 = vcombine.high %v33_v0, %v33_v0  ;;  %v226_v4 = vcombine.high %v34_v1, %v34_v1  ;;  %v223_v5 = vcombine.low %v33_v0, %v33_v0  ;;  %v225_v6 = vcombine.low %v34_v1, %v34_v1  ;;  %v237_v7 = vld [vmem:[%s333_s0 + $0x4] ss:$16 sps:$4 sm:$0xff]   ;;  %v239_v8 = vld [vmem:[%s333_s0 + $0xc] ss:$16 sps:$4 sm:$0xff]   ;;  %v241_v11 = vld [vmem:[%s333_s0] ss:$16 sps:$4 sm:$0xff]  }
   0x3   :  { %v242_v12 = vld [vmem:[%s333_s0 + $0x8] ss:$16 sps:$4 sm:$0xff]   ;;  %v28_v13 = vld [vmem:[%s334_s1] sm:$0xf]  ;;  %26 = vst.msk [vmem:[#allocation2] sm:$0xff] %vm25_vm2, %v246_v14  ;;  %27 = vst.msk [vmem:[#allocation3] sm:$0xff] %vm25_vm2, %v246_v14 }
   0x4   :  { %227 = vmatprep.subr.msk.bf16.mxu0 %vm69_vm0, %v224_v3  ;;  %229 = vmatprep.subr.msk.bf16.mxu1 %vm69_vm0, %v226_v4  ;;  %v71_v9 = vsel %vm69_vm0, %v223_v5, 0  ;;  %v77_v10 = vsel %vm69_vm0, %v225_v6, 0  ;;  %v198_v46 = vld [vmem:[%s336_s2] sm:$0xff] }
   0x5   :  { %95 = vmatpush1.bf16.msra.mxu0 %v71_v9  ;;  %136 = vmatpush1.bf16.msra.mxu1 %v77_v10  ;;  %v203_v49 = vld [vmem:[%s337_s3] sm:$0xff] }
   0x6   :  { %96 = vmatprep.subr.bf16.mxu0 %v237_v7  ;;  %137 = vmatprep.subr.bf16.mxu1 %v239_v8 }
   0x9   :  { %97 = vmatpush1.bf16.msra.mxu0 %v241_v11  ;;  %138 = vmatpush1.bf16.msra.mxu1 %v242_v12 }
   0xa   :  { %v168_v33 = vld [vmem:[#allocation2] sm:$0xff]  ;;  %v177_v36 = vld [vmem:[#allocation3] sm:$0xff] }
   0xc   :  { %228 = vmatmul.mubr.msk.bf16.vlgmr.msra.gmra.mxu0 %vm65_vm1, %v28_v13  ;;  %230 = vmatmul.mubr.msk.bf16.vlgmr.msra.gmra.mxu1 %vm65_vm1, %v28_v13 }
  0xcc   :  { %v116_v15 = vpop.f32.mrf.mxu0  ;;  %v157_v16 = vpop.f32.mrf.mxu1 }
  0xcd   :  { %164 = vst [vmem:[%s335_s4] sm:$0xff] %v116_v15  ;;  %166 = vst [vmem:[%s335_s4 + $0x10] sm:$0xff] %v157_v16  ;;  %v178_v19 = vmul.f32 %v116_v15, %v116_v15  ;;  %v180_v20 = vmul.f32 %v157_v16, %v157_v16 }
  0xce   :  { %v118_v17 = vpop.f32.mrf.mxu0  ;;  %v159_v18 = vpop.f32.mrf.mxu1 }
  0xcf   :  { %165 = vst [vmem:[%s335_s4 + $0x8] sm:$0xff] %v118_v17  ;;  %v169_v21 = vadd.f32 %v118_v17, %v116_v15  ;;  %v179_v22 = vmul.f32 %v118_v17, %v118_v17  ;;  %167 = vst [vmem:[%s335_s4 + $0x18] sm:$0xff] %v159_v18  ;;  %v181_v31 = vmul.f32 %v159_v18, %v159_v18 }
  0xd0   :  { %v120_v23 = vpop.f32.mrf.mxu0  ;;  %v161_v24 = vpop.f32.mrf.mxu1 }
  0xd1   :  { %v170_v25 = vadd.f32 %v169_v21, %v157_v16  ;;  %v182_v26 = vadd.f32 %v179_v22, %v178_v19 }
  0xd2   :  { %v121_v27 = vpop.f32.mrf.mxu0  ;;  %v162_v28 = vpop.f32.mrf.mxu1 }
  0xd3   :  { %v171_v29 = vadd.f32 %v170_v25, %v159_v18  ;;  %v183_v30 = vadd.f32 %v182_v26, %v180_v20 }
  0xd5   :  { %172 = vadd.xlane.f32.xlu0 %v171_v29  ;;  %v184_v32 = vadd.f32 %v183_v30, %v181_v31 }
  0xd9   :  { %185 = vadd.xlane.f32.xlu0 %v184_v32 }
 0x15e   :  { %v173_v34 = vpop.xlane.xlu0 %172 }
 0x15f   :  { %v174_v35 = vadd.f32 %v173_v34, %v168_v33 }
 0x161   :  { %176 = vst.msk [vmem:[#allocation2] sm:$0xff] %vm25_vm2, %v174_v35 }
 0x162   :  { %v186_v37 = vpop.xlane.xlu0 %185 }
 0x163   :  { %v187_v38 = vadd.f32 %v186_v37, %v177_v36 }
 0x165   :  { %188 = vst.msk [vmem:[#allocation3] sm:$0xff] %vm25_vm2, %v187_v38 }
 0x168   :  { %v192_v39 = vld [vmem:[#allocation2] sm:$0xff] }
 0x169   :  { %v193_v40 = vmul.f32 0.001953125, %v192_v39 }
 0x16b   :  { %v196_v42 = vmul.f32 %v193_v40, %v193_v40 }
 0x16c   :  { %v194_v41 = vld [vmem:[#allocation3] sm:$0xff] }
 0x16d   :  { %v195_v43 = vmul.f32 0.001953125, %v194_v41 }
 0x16f   :  { %v197_v44 = vsub.f32 %v195_v43, %v196_v42 }
 0x171   :  { %v199_v45 = vadd.f32 1e-05, %v197_v44 }
 0x173   :  { %243 = vrsqrt.f32 %v199_v45 }
 0x180   :  { %v244_v47 = vpop.eup %243 }
 0x181   :  { %v201_v48 = vmul.f32 %v244_v47, %v198_v46 }
 0x183   :  { %202 = vst.msk [vmem:[%s338_s5] sm:$0xff] %vm25_vm2, %v201_v48  ;;  %v204_v50 = vmul.f32 %v201_v48, %v193_v40 }
 0x185   :  { %v205_v51 = vsub.f32 %v203_v49, %v204_v50 }
 0x187   :  { %206 = vst.msk [vmem:[%s339_s6] sm:$0xff] %vm25_vm2, %v205_v51 }

</bundles_post_ra>
